<compile_context>
chip_gen: v5e
topology: v5e:2x2
jax: 0.10.0
libtpu: 0.0.40
codegen_flags: <defaults>
</compile_context>

<pallas_src>
import jax
import jax.numpy as jnp
from jax.experimental import pallas as pl
from jax.experimental.pallas import tpu as pltpu


_MiB = 1024 * 1024
# Working-set budget for double-buffered blocks + accumulator + resident W.
_TILE_VMEM_BUDGET = 16 * _MiB
# Raised scoped-VMEM limit (v5e default is only 16 MiB; v6e/v7x default 32 MiB).
_VMEM_LIMIT = 32 * _MiB
# Max double-buffered resident-W footprint allowed on the fused path.
_RESIDENT_W_BUDGET = 4 * _MiB


# ----------------------------- helpers --------------------------------------

def _round_up(v, m):
    return ((v + m - 1) // m) * m


def _spmm_tile_bytes(tm, tk, d_feat, d_out, adj_isz, feat_isz, out_isz, w_bytes):
    """Estimated VMEM use of one spmm grid step (double-buffered blocks)."""
    return (2 * tm * tk * adj_isz          # adj block
            + 2 * tk * d_feat * feat_isz   # feature block
            + 2 * tm * d_out * out_isz     # output block
            + tm * d_feat * 4              # f32 accumulator scratch
            + 2 * w_bytes)                 # resident W (fused path)


def _select_spmm_tiles(n_pad, batch, d_feat, d_out,
                       adj_isz, feat_isz, out_isz, w_bytes):
    """Pick (tm, tk): largest tiles that divide n_pad and fit the VMEM budget.

    Preference order: >=2 parallel (b, i) work items (keeps both v7x
    TensorCores busy), then largest tm (fewest re-reads of the feature
    operand), then largest tk (fewest grid steps / fullest MXU feeds).
    """
    best = None
    for tm in (1024, 512, 256, 128):
        if n_pad % tm:
            continue
        for tk in (1024, 512, 256, 128):
            if n_pad % tk:
                continue
            use = _spmm_tile_bytes(tm, tk, d_feat, d_out,
                                   adj_isz, feat_isz, out_isz, w_bytes)
            if use > _TILE_VMEM_BUDGET:
                continue
            m_tiles = n_pad // tm
            score = (min(batch * m_tiles, 2), tm, tk)
            if best is None or score > best[0]:
                best = (score, tm, tk)
    if best is None:
        return 128, 128
    return best[1], best[2]


# ----------------------------- kernels --------------------------------------

def _spmm_fused_w_kernel(adj_ref, x_ref, w_ref, o_ref, acc_ref):
    """acc += adj_tile @ x_tile over k; at the last k: out = acc_f32 @ W."""
    # adj_ref: (1, tm, tk)   x_ref: (1, tk, d_in)   w_ref: (d_in, d_out)
    # o_ref:   (1, tm, d_out)   acc_ref: (tm, d_in) f32
    k = pl.program_id(2)

    @pl.when(k == 0)
    def _():
        acc_ref[...] = jnp.zeros_like(acc_ref)

    acc_ref[...] += jnp.dot(adj_ref[0], x_ref[0],
                            preferred_element_type=jnp.float32)

    @pl.when(k == pl.num_programs(2) - 1)
    def _():
        # Keep the accumulated LHS in f32 for the final @W so precision over
        # the N-dim reduction is preserved; amortized over k_tiles steps.
        o_ref[0] = jnp.dot(acc_ref[...], w_ref[...].astype(jnp.float32),
                           preferred_element_type=jnp.float32).astype(o_ref.dtype)


def _spmm_out_accum_kernel(adj_ref, x_ref, o_ref):
    """f32 output: accumulate straight into the resident output block."""
    # adj_ref: (1, tm, tk)   x_ref: (1, tk, d_feat)   o_ref: (1, tm, d_feat) f32
    k = pl.program_id(2)

    @pl.when(k == 0)
    def _():
        o_ref[...] = jnp.zeros_like(o_ref)

    o_ref[0] += jnp.dot(adj_ref[0], x_ref[0],
                        preferred_element_type=jnp.float32).astype(o_ref.dtype)


def _spmm_kernel(adj_ref, x_ref, o_ref, acc_ref):
    """acc += adj_tile @ feat_tile over k; cast/store at the last k."""
    k = pl.program_id(2)

    @pl.when(k == 0)
    def _():
        acc_ref[...] = jnp.zeros_like(acc_ref)

    acc_ref[...] += jnp.dot(adj_ref[0], x_ref[0],
                            preferred_element_type=jnp.float32)

    @pl.when(k == pl.num_programs(2) - 1)
    def _():
        o_ref[0] = acc_ref[...].astype(o_ref.dtype)


def _feature_matmul_kernel(x_ref, w_ref, o_ref):
    """Row-tiled dense matmul: (tr, d_in) @ (d_in, d_out)."""
    o_ref[...] = jnp.dot(x_ref[...], w_ref[...],
                         preferred_element_type=jnp.float32).astype(o_ref.dtype)


# ----------------------------- pallas_call wrappers --------------------------

def _feature_transform(x2d, w, out_dtype):
    """x2d: (R, d_in) @ w: (d_in, d_out) -> (R, d_out); all dims 128-aligned."""
    R, d_in = x2d.shape
    d_out = w.shape[1]
    out_isz = jnp.dtype(out_dtype).itemsize
    w_bytes = 2 * d_in * d_out * w.dtype.itemsize  # W is double-buffered

    tr = 128
    for cand in (1024, 512, 256, 128):
        if R % cand:
            continue
        use = (2 * cand * d_in * x2d.dtype.itemsize
               + 2 * cand * d_out * out_isz + w_bytes)
        if use <= _TILE_VMEM_BUDGET:
            tr = cand
            break

    flops = 2 * R * d_in * d_out
    bytes_accessed = int(x2d.size * x2d.dtype.itemsize
                         + w.size * w.dtype.itemsize
                         + R * d_out * out_isz)

    return pl.pallas_call(
        _feature_matmul_kernel,
        out_shape=jax.ShapeDtypeStruct((R, d_out), out_dtype),
        grid_spec=pltpu.PrefetchScalarGridSpec(
            num_scalar_prefetch=0,
            grid=(R // tr,),
            in_specs=[
                pl.BlockSpec((tr, d_in), lambda r: (r, 0)),
                pl.BlockSpec((d_in, d_out), lambda r: (0, 0)),  # W stays resident
            ],
            out_specs=pl.BlockSpec((tr, d_out), lambda r: (r, 0)),
        ),
        compiler_params=pltpu.CompilerParams(
            dimension_semantics=("parallel",),
            vmem_limit_bytes=_VMEM_LIMIT,
        ),
        cost_estimate=pl.CostEstimate(
            flops=int(flops), transcendentals=0, bytes_accessed=bytes_accessed),
    )(x2d, w)


def _spmm(adj, feat, w, tm, tk, out_dtype):
    """out[b] = adj[b] @ feat[b] (@ W if w is not None).  All dims 128-aligned."""
    B, n_pad, _ = adj.shape
    d_feat = feat.shape[-1]
    d_out = d_feat if w is None else w.shape[1]
    m_tiles = n_pad // tm
    k_tiles = n_pad // tk
    out_isz = jnp.dtype(out_dtype).itemsize

    flops = 2 * B * n_pad * n_pad * d_feat
    # feat's index map ignores the row-tile index i -> it is re-streamed from
    # HBM once per row tile; count it m_tiles times, adj in its compute dtype.
    bytes_accessed = int(adj.size * adj.dtype.itemsize
                         + m_tiles * feat.size * feat.dtype.itemsize
                         + B * n_pad * d_out * out_isz)

    adj_spec = pl.BlockSpec((1, tm, tk), lambda b, i, k: (b, i, k))
    feat_spec = pl.BlockSpec((1, tk, d_feat), lambda b, i, k: (b, k, 0))
    out_spec = pl.BlockSpec((1, tm, d_out), lambda b, i, k: (b, i, 0))

    if w is not None:
        kernel = _spmm_fused_w_kernel
        in_specs = [adj_spec, feat_spec,
                    pl.BlockSpec((d_feat, d_out), lambda b, i, k: (0, 0))]
        operands = (adj, feat, w)
        scratch = [pltpu.VMEM((tm, d_feat), jnp.float32)]
        flops += 2 * B * n_pad * d_feat * d_out
        bytes_accessed += int(w.size * w.dtype.itemsize)
    elif jnp.dtype(out_dtype) == jnp.dtype(jnp.float32):
        # f32 output block is resident across k: accumulate into it directly,
        # no scratch (frees VMEM for bigger tiles, drops the finalize copy).
        kernel = _spmm_out_accum_kernel
        in_specs = [adj_spec, feat_spec]
        operands = (adj, feat)
        scratch = []
    else:
        kernel = _spmm_kernel
        in_specs = [adj_spec, feat_spec]
        operands = (adj, feat)
        scratch = [pltpu.VMEM((tm, d_feat), jnp.float32)]

    return pl.pallas_call(
        kernel,
        out_shape=jax.ShapeDtypeStruct((B, n_pad, d_out), out_dtype),
        grid_spec=pltpu.PrefetchScalarGridSpec(
            num_scalar_prefetch=0,
            grid=(B, m_tiles, k_tiles),
            in_specs=in_specs,
            out_specs=out_spec,
            scratch_shapes=scratch,
        ),
        compiler_params=pltpu.CompilerParams(
            # batch + row tiles parallel (megacore / v7x 2-TC), reduction last.
            dimension_semantics=("parallel", "parallel", "arbitrary"),
            vmem_limit_bytes=_VMEM_LIMIT,
        ),
        cost_estimate=pl.CostEstimate(
            flops=int(flops), transcendentals=0, bytes_accessed=bytes_accessed),
    )(*operands)


# ----------------------------- public entry point ---------------------------

def graph_conv(x, adj, weight, *, compute_dtype=jnp.bfloat16):
    """y[b] = adj[b] @ x[b] @ weight   (GraphConv.forward).

    compute_dtype: dtype for the MXU operands (adj / features / W).  Defaults
    to bf16 (f32 accumulation is kept inside the kernels).  Pass jnp.float32
    or None for exact f32 compute.
    """
    B, N, d_in = x.shape
    d_out = weight.shape[1]
    assert adj.shape == (B, N, N)
    assert weight.shape == (d_in, d_out)

    out_dtype = x.dtype
    cdt = jnp.dtype(compute_dtype) if compute_dtype is not None else jnp.dtype(x.dtype)

    x_c = x.astype(cdt)
    adj_c = adj.astype(cdt)
    w_c = weight.astype(cdt)

    # Pad matmul dims to multiples of 128 (zero padding is exact for this
    # matmul chain) -> lane-dense MXU operands, unmasked vector stores.
    # Only pad when actually needed: padding adj materializes a full HBM copy
    # of the dominant operand.
    n_pad = _round_up(N, 128)
    d_in_pad = _round_up(d_in, 128)
    d_out_pad = _round_up(d_out, 128)

    if n_pad != N or d_in_pad != d_in:
        x_c = jnp.pad(x_c, ((0, 0), (0, n_pad - N), (0, d_in_pad - d_in)))
    if n_pad != N:
        adj_c = jnp.pad(adj_c, ((0, 0), (0, n_pad - N), (0, n_pad - N)))
    if d_in_pad != d_in or d_out_pad != d_out:
        w_c = jnp.pad(w_c, ((0, d_in_pad - d_in), (0, d_out_pad - d_out)))

    adj_isz = adj_c.dtype.itemsize
    out_isz = jnp.dtype(out_dtype).itemsize

    # Fused path only if the operand ordering favors it AND the resident
    # (double-buffered) W block stays small (v5e has only 16 MiB scoped VMEM).
    w_single_bytes = d_in_pad * d_out_pad * w_c.dtype.itemsize
    use_fused = (d_in_pad <= d_out_pad) and (2 * w_single_bytes <= _RESIDENT_W_BUDGET)

    if use_fused:
        # (adj @ x) @ W : accumulate the narrow d_in features, apply W once at
        # finalize with an f32 LHS.
        tm, tk = _select_spmm_tiles(n_pad, B, d_in_pad, d_out_pad,
                                    adj_isz, x_c.dtype.itemsize, out_isz,
                                    w_single_bytes)
        out_p = _spmm(adj_c, x_c, w_c, tm, tk, out_dtype)
    else:
        # adj @ (x @ W) : hoist x@W into its own lane-dense matmul.  xw is
        # emitted in the compute dtype (bf16 by default) so the m_tiles
        # re-reads by the spmm stay cheap.
        xw = _feature_transform(x_c.reshape(B * n_pad, d_in_pad), w_c, cdt)
        xw = xw.reshape(B, n_pad, d_out_pad)
        tm, tk = _select_spmm_tiles(n_pad, B, d_out_pad, d_out_pad,
                                    adj_isz, xw.dtype.itemsize, out_isz, 0)
        out_p = _spmm(adj_c, xw, None, tm, tk, out_dtype)

    if n_pad != N or d_out_pad != d_out:
        out_p = out_p[:, :N, :d_out]
    return out_p


# ----------------------------- self-test -------------------------------------

if __name__ == "__main__":
    B, N, D_IN, D_OUT = 2, 16, 8, 32

    key = jax.random.PRNGKey(0)
    kx, ka, kw = jax.random.split(key, 3)
    x = jax.random.normal(kx, (B, N, D_IN), dtype=jnp.float32)
    adj = jax.random.normal(ka, (B, N, N), dtype=jnp.float32)
    weight = jax.random.normal(kw, (D_IN, D_OUT), dtype=jnp.float32) * 0.1

    y_ref = jnp.einsum("bij,bjk,kl->bil", adj, x, weight, precision="highest")

    # 1) Default bf16 compute (f32 accumulation), fused-W path (d_in <= d_out).
    y = graph_conv(x, adj, weight)
    jax.block_until_ready(y)
    assert y.shape == (B, N, D_OUT)
    assert y.dtype == jnp.float32
    assert jnp.allclose(y, y_ref, atol=1e-1, rtol=1e-1)

    # 2) Exact f32 compute, fused-W path.
    y_f32 = graph_conv(x, adj, weight, compute_dtype=jnp.float32)
    jax.block_until_ready(y_f32)
    assert jnp.allclose(y_f32, y_ref, atol=1e-3, rtol=1e-3)

    # 3) d_out < d_in path: x@W hoisted into its own kernel (bf16 xw), narrow
    #    spmm accumulating directly into the f32 output block.
    D_IN2, D_OUT2 = 160, 32
    k2x, k2w = jax.random.split(jax.random.PRNGKey(1), 2)
    x2 = jax.random.normal(k2x, (B, N, D_IN2), dtype=jnp.float32)
    w2 = jax.random.normal(k2w, (D_IN2, D_OUT2), dtype=jnp.float32) * 0.1
    y2 = graph_conv(x2, adj, w2)
    jax.block_until_ready(y2)
    y2_ref = jnp.einsum("bij,bjk,kl->bil", adj, x2, w2, precision="highest")
    assert y2.shape == (B, N, D_OUT2)
    assert jnp.allclose(y2, y2_ref, atol=1e-1, rtol=1e-1)

    # 4) Non-128-aligned N with B == 1 (padding + multi-row-tile grid), f32.
    N3 = 200
    k3x, k3a = jax.random.split(jax.random.PRNGKey(2), 2)
    x3 = jax.random.normal(k3x, (1, N3, D_IN), dtype=jnp.float32)
    adj3 = jax.random.normal(k3a, (1, N3, N3), dtype=jnp.float32)
    y3 = graph_conv(x3, adj3, weight, compute_dtype=jnp.float32)
    jax.block_until_ready(y3)
    y3_ref = jnp.einsum("bij,bjk,kl->bil", adj3, x3, weight, precision="highest")
    assert y3.shape == (1, N3, D_OUT)
    assert jnp.allclose(y3, y3_ref, atol=1e-3, rtol=1e-3)

    print("KERNEL_OK")
</pallas_src>

<mosaic_0001>
module attributes {stable_mosaic.version = 11 : i64} {
  func.func @_spmm_fused_w_kernel(%arg0: i32, %arg1: i32, %arg2: i32, %arg3: memref<1x128x128xbf16, #tpu.memory_space<vmem>>, %arg4: memref<1x128x128xbf16, #tpu.memory_space<vmem>>, %arg5: memref<128x128xbf16, #tpu.memory_space<vmem>>, %arg6: memref<1x128x128xf32, #tpu.memory_space<vmem>>, %arg7: memref<128x128xf32, #tpu.memory_space<vmem>>) attributes {dimension_semantics = [#tpu.dimension_semantics<parallel>, #tpu.dimension_semantics<parallel>, #tpu.dimension_semantics<arbitrary>], iteration_bounds = array<i64: 2, 1, 1>, scalar_prefetch = 0 : i64, scratch_operands = 1 : i64, tpu.core_type = #tpu.core_type<tc>, window_params = [{transform_indices = @transform_0, window_bounds = array<i64: 1, 128, 128>}, {transform_indices = @transform_1, window_bounds = array<i64: 1, 128, 128>}, {pipeline_mode = #tpu.pipeline_mode<synchronous>, transform_indices = @transform_2, window_bounds = array<i64: 128, 128>}, {transform_indices = @transform_3, window_bounds = array<i64: 1, 128, 128>}]} {
    %c0_i32 = arith.constant 0 : i32
    %0 = arith.cmpi eq, %arg2, %c0_i32 : i32
    %1 = arith.extui %0 : i1 to i32
    %c0_i32_0 = arith.constant 0 : i32
    %2 = arith.cmpi ne, %1, %c0_i32_0 : i32
    scf.if %2 {
      %cst_12 = arith.constant 0.000000e+00 : f32
      %14 = vector.broadcast %cst_12 : f32 to vector<128x128xf32>
      %c0_13 = arith.constant 0 : index
      %c0_14 = arith.constant 0 : index
      %15 = vector.load %arg7[%c0_13, %c0_14] : memref<128x128xf32, #tpu.memory_space<vmem>>, vector<128x128xf32>
      tpu.vector_store %arg7[%c0_13, %c0_14], %14 {strides = array<i32>} : memref<128x128xf32, #tpu.memory_space<vmem>>, vector<128x128xf32>,
    } else {
    }
    %c0 = arith.constant 0 : index
    %c0_1 = arith.constant 0 : index
    %3 = vector.load %arg7[%c0, %c0_1] : memref<128x128xf32, #tpu.memory_space<vmem>>, vector<128x128xf32>
    %c0_2 = arith.constant 0 : index
    %c0_3 = arith.constant 0 : index
    %c0_4 = arith.constant 0 : index
    %4 = vector.load %arg3[%c0_2, %c0_3, %c0_4] : memref<1x128x128xbf16, #tpu.memory_space<vmem>>, vector<1x128x128xbf16>
    %5 = vector.shape_cast %4 : vector<1x128x128xbf16> to vector<128x128xbf16>
    %c0_5 = arith.constant 0 : index
    %c0_6 = arith.constant 0 : index
    %c0_7 = arith.constant 0 : index
    %6 = vector.load %arg4[%c0_5, %c0_6, %c0_7] : memref<1x128x128xbf16, #tpu.memory_space<vmem>>, vector<1x128x128xbf16>
    %7 = vector.shape_cast %6 : vector<1x128x128xbf16> to vector<128x128xbf16>
    %cst = arith.constant dense<0.000000e+00> : vector<128x128xf32>
    %8 = tpu.matmul %5, %7, %cst {dimension_numbers = #tpu.dot_dimension_numbers<[1], [0], [0], [1], [0, 0, 1, 1], [], []>} : vector<128x128xbf16>, vector<128x128xbf16>, vector<128x128xf32> -> vector<128x128xf32>
    %9 = arith.addf %3, %8 : vector<128x128xf32>
    %c0_8 = arith.constant 0 : index
    %c0_9 = arith.constant 0 : index
    %10 = vector.load %arg7[%c0_8, %c0_9] : memref<128x128xf32, #tpu.memory_space<vmem>>, vector<128x128xf32>
    tpu.vector_store %arg7[%c0_8, %c0_9], %9 {strides = array<i32>} : memref<128x128xf32, #tpu.memory_space<vmem>>, vector<128x128xf32>,
    %c0_i32_10 = arith.constant 0 : i32
    %11 = arith.cmpi eq, %arg2, %c0_i32_10 : i32
    %12 = arith.extui %11 : i1 to i32
    %c0_i32_11 = arith.constant 0 : i32
    %13 = arith.cmpi ne, %12, %c0_i32_11 : i32
    scf.if %13 {
      %c0_12 = arith.constant 0 : index
      %c0_13 = arith.constant 0 : index
      %14 = vector.load %arg7[%c0_12, %c0_13] : memref<128x128xf32, #tpu.memory_space<vmem>>, vector<128x128xf32>
      %c0_14 = arith.constant 0 : index
      %c0_15 = arith.constant 0 : index
      %15 = vector.load %arg5[%c0_14, %c0_15] : memref<128x128xbf16, #tpu.memory_space<vmem>>, vector<128x128xbf16>
      %16 = arith.extf %15 : vector<128x128xbf16> to vector<128x128xf32>
      %cst_16 = arith.constant dense<0.000000e+00> : vector<128x128xf32>
      %17 = tpu.matmul %14, %16, %cst_16 {dimension_numbers = #tpu.dot_dimension_numbers<[1], [0], [0], [1], [0, 0, 1, 1], [], []>} : vector<128x128xf32>, vector<128x128xf32>, vector<128x128xf32> -> vector<128x128xf32>
      %c0_17 = arith.constant 0 : index
      %c0_18 = arith.constant 0 : index
      %c0_19 = arith.constant 0 : index
      %18 = vector.load %arg6[%c0_17, %c0_18, %c0_19] : memref<1x128x128xf32, #tpu.memory_space<vmem>>, vector<1x128x128xf32>
      %19 = vector.shape_cast %18 : vector<1x128x128xf32> to vector<128x128xf32>
      %20 = vector.shape_cast %17 : vector<128x128xf32> to vector<1x128x128xf32>
      tpu.vector_store %arg6[%c0_17, %c0_18, %c0_19], %20 {strides = array<i32>} : memref<1x128x128xf32, #tpu.memory_space<vmem>>, vector<1x128x128xf32>,
    } else {
    }
    return
  }
  func.func @transform_0(%arg0: i32, %arg1: i32, %arg2: i32) -> (i32, i32, i32) {
    %c0_i32 = arith.constant 0 : i32
    return %arg0, %arg1, %arg2 : i32, i32, i32
  }
  func.func @transform_1(%arg0: i32, %arg1: i32, %arg2: i32) -> (i32, i32, i32) {
    %c0_i32 = arith.constant 0 : i32
    %c0_i32_0 = arith.constant 0 : i32
    return %arg0, %arg2, %c0_i32 : i32, i32, i32
  }
  func.func @transform_2(%arg0: i32, %arg1: i32, %arg2: i32) -> (i32, i32) {
    %c0_i32 = arith.constant 0 : i32
    %c0_i32_0 = arith.constant 0 : i32
    %c0_i32_1 = arith.constant 0 : i32
    return %c0_i32, %c0_i32_0 : i32, i32
  }
  func.func @transform_3(%arg0: i32, %arg1: i32, %arg2: i32) -> (i32, i32, i32) {
    %c0_i32 = arith.constant 0 : i32
    %c0_i32_0 = arith.constant 0 : i32
    return %arg0, %arg1, %c0_i32 : i32, i32, i32
  }
}

</mosaic_0001>

<bundles_post_ra>
// kernel: tpu_custom_call.1
= control target key start
LH: loop header
LB: loop body
LE: loop exit
PB: predicated region body
PF: predicated region fallthrough
CT: control target
= control target key end

     0   :  { %s1454_s0 = inlined_call_operand.hbm [shape: bf16[2,128,128], index: 0, kind: input, shape index: {}]   ;;  %s1455_s1 = inlined_call_operand.hbm [shape: bf16[2,128,128], index: 1, kind: input, shape index: {}]   ;;  %s1456_s2 = inlined_call_operand.hbm [shape: bf16[128,128], index: 2, kind: input, shape index: {}]   ;;  %s1457_s3 = inlined_call_operand.hbm [shape: f32[2,128,128], index: 3, kind: output, shape index: {}]  }
   0x1   :  { %1464 = sst [smem:[#allocation16_spill]] %s1456_s2 }
   0x2   :  { %8 = vsyncpa [#allocation4], 0 }
   0x3   :  { %10 = vsyncpa [#allocation4 + $0x1], 0 }
   0x4   :  { %11 = vsyncpa [#allocation7], 0 }
   0x5   :  { %13 = vsyncpa [#allocation7 + $0x1], 0 }
   0x6   :  { %14 = vsyncpa [#allocation5], 0 }
   0x7   :  { %16 = vsyncpa [#allocation5 + $0x1], 0  ;;  %s1261_s12 = smov 0   ;;  %s1263_s13 = smov 0  }
   0x8   :  { %s1265_s14 = smov 0   ;;  %s1267_s15 = smov 0  }
   0x9   :  { %s1269_s16 = smov 0   ;;  %s1271_s17 = smov 0  }
   0xa LB: > { %1465 = sst [smem:[#allocation14_spill]] %s1230_s16  ;;  %s1292_s18 = sadd.s32 4294967295, %s1234_s17   ;;  %s1234_s17 = sphi %s1271_s17, %s22_s17   ;;  %s1230_s16 = sphi %s1269_s16, %s1476_s16   ;;  %s1226_s15 = sphi %s1267_s15, %s1475_s15   ;;  %s1222_s14 = sphi %s1265_s14, %s1479_s14   ;;  %s1218_s13 = sphi %s1263_s13, %s1478_s13   ;;  %s1214_s12 = sphi %s1261_s12, %s1477_s12  }
   0xb   : > { %s806_s19 = sadd.s32 4294967294, %s1234_s17   ;;  %p65_p0 = scmp.ne.s32.totalorder %s1218_s13, %s1214_s12 }
   0xc   : > { %p66_p1 = scmp.eq.s32.totalorder %s1292_s18, 0  ;;  %p140_p2 = scmp.eq.s32.totalorder %s1292_s18, 1 }
   0xd   : > { %p146_p3 = scmp.eq.s32.totalorder %s806_s19, 1  ;;  %p807_p5 = scmp.ge.s32.totalorder %s1234_s17, 1 }
   0xe   : > { %p1301_p4 = por %p66_p1, %p65_p0  ;;  %p153_p7 = scmp.lt.s32.totalorder %s1234_s17, 3 }
   0xf   : > { %p1306_p6 = por %p146_p3, %p65_p0  ;;  %s1468_s2 = sld [smem:[#allocation16_spill]] }
  0x10   : > { %p1314_p8 = pnand %p807_p5, %p153_p7  ;;  %s1236_s26 = smov [#allocation8]  }
  0x11   : > { %s166_s27 = sshll.u32 %s1236_s26, 4  ;;  %p809_p11 = scmp.ge.s32.totalorder %s1234_s17, 2  ;;  %s167_s27 = int_to_ptr.vmem [resolvable:$true] %s166_s27 }
  0x12   : > { %p982_p9 = pneg %p1314_p8  ;;  %s1458_s28 = smov 64  }
  0x13   : > { %s1460_s29 = smov 4   ;;  %s41_s30 = sadd.s32 1, %s1230_s16 }
  0x14   : > { %p983_p10 = pnand %p982_p9, %p66_p1  ;;  %p43_p12 = scmp.ge.s32.totalorder %s41_s30, 2 }
  0x15   : > { %s164_s24 = sshll.u32 %s1468_s2, 4  ;;  %s52_s4 = sadd.s32 1, %s1222_s14  ;;  %s165_s24 = int_to_ptr.hbm [resolvable:$true] %s164_s24 }
  0x16   : > { %985 = dma.hbm_to_vmem [thread:$0]  (!%p983_p10), %s165_s24, 1024, %s167_s27, [#allocation7], %s1458_s28, %s1458_s28, %s1460_s29  }
  0x17   : > { %p59_p13 = scmp.ne.s32.totalorder %s1222_s14, %s1218_s13  ;;  %p60_p0 = scmp.eq.s32.totalorder %s1234_s17, 0 }
  0x18   : > { %s1481_s30 = smov (%p43_p12, %s41_s30), 0  ;;  %p998_p7 = scmp.lt.s32.totalorder %s1234_s17, 2 }
  0x19   : > { %1470 = sst [smem:[#allocation15_spill]] %s1481_s30  ;;  %p1333_p3 = por %p60_p0, %p59_p13 }
  0x1a   : > { %p1339_p5 = por %p140_p2, %p59_p13  ;;  %s45_s7 = ssub.s32 %s1230_s16, %s1481_s30 }
  0x1b   : > { %p50_p9 = scmp.eq.s32.totalorder %s45_s7, 0  ;;  %s180_s8 = sand.u32 1, %s1222_s14  }
  0x1c   : > { %s810_s9 = sshll.u32 %s180_s8, 6  ;;  %s890_s11 = sshll.u32 %s1230_s16, 6 }
  0x1d   : > { %s1348_s10 = scalar_select %p50_p9, %s1222_s14, %s52_s4  }
  0x1e   : > { %s192_s23 = scalar_lea.hbm %s1454_s0, %s890_s11  ;;  %s184_s24 = scalar_lea.vmem [#allocation3], %s810_s9 }
  0x1f   : > { %s195_s26 = sshll.u32 %s184_s24, 4  ;;  %s193_s27 = sshll.u32 %s192_s23, 4  ;;  %s196_s26 = int_to_ptr.vmem [resolvable:$true] %s195_s26  ;;  %s194_s27 = int_to_ptr.hbm [resolvable:$true] %s193_s27 }
  0x20   : > { %p987_p2 = pnand %p998_p7, %p1333_p3  ;;  %s216_s7 = scalar_lea.hbm %s1455_s1, %s890_s11 }
  0x21   : > { %s217_s2 = sshll.u32 %s216_s7, 4  ;;  %s181_s4 = scalar_lea.sflag [#allocation4], %s180_s8  ;;  %s218_s2 = int_to_ptr.hbm [resolvable:$true] %s217_s2 }
  0x22   : > { %s1473_s30 = smov 4   ;;  %s1474_s16 = smov 64  }
  0x23   : > { %989 = dma.hbm_to_vmem [thread:$0]  (!%p987_p2), %s194_s27, 1024, %s196_s26, %s181_s4, %s1474_s16, %s1474_s16, %s1473_s30  }
  0x24   : > { %s209_s19 = scalar_lea.vmem [#allocation6], %s810_s9  ;;  %s205_s24 = sand.u32 1, %s1234_s17  }
  0x25   : > { %s219_s22 = sshll.u32 %s209_s19, 4  ;;  %s206_s23 = scalar_lea.sflag [#allocation7], %s205_s24  ;;  %s220_s22 = int_to_ptr.vmem [resolvable:$true] %s219_s22 }
  0x26   : > { %992 = dma.hbm_to_vmem [thread:$0]  (!%p987_p2), %s218_s2, 1024, %s220_s22, %s206_s23, %s1474_s16, %s1474_s16, %s1473_s30  }
  0x27   : > { %231 = sbr.rel (%p1314_p8) target bundleno = 406 (0x196), region = 32  ;;  %s1369_s28 = sand.u32 (!%p1314_p8), 1, %s1218_s13  }
  0x28   : > { %s817_s29 = sshll.u32 (!%p1314_p8), %s1369_s28, 6  ;;  %s234_s5 = scalar_lea.sflag (!%p1314_p8), [#allocation4], %s1369_s28 }
  0x29   : > { %s1373_s8 = scalar_lea.vmem (!%p1314_p8), [#allocation3], %s817_s29 }
  0x2c   : > { %1197 = dma.done.wait (%p1301_p4), %s234_s5, 1024  }
  0x2d   : > { %1199 = vsyncadd (%p1301_p4), %s234_s5, 4294966272  ;;  %s243_s2 = sand.u32 1, %s1292_s18   ;;  %s247_s25 = scalar_lea.vmem [#allocation6], %s817_s29 }
  0x2e   : > { %s244_s16 = scalar_lea.sflag [#allocation7], %s243_s2 }
  0x2f   : > { %1201 = dma.done.wait (%p1301_p4), %s244_s16, 1024  }
  0x30   : > { %1203 = vsyncadd (%p1301_p4), %s244_s16, 4294966272 }
  0x31   : > { %1205 = dma.done.wait (%p66_p1), [#allocation7], 1024  }
  0x32   : > { %1207 = vsyncadd (%p66_p1), [#allocation7], 4294966272  ;;  %v907_v0 = vld [vmem:[%s247_s25 + $0x38] sm:$0xff]  ;;  %v906_v1 = vld [vmem:[%s247_s25 + $0x30] sm:$0xff]  ;;  %s820_s18 = sshll.u32 %s1369_s28, 7  ;;  %s908_s30 = sshll.u32 %s1226_s15, 7 }
  0x33   : > { %948 = vmatpush.bf16.msra.mxu2 %v907_v0  ;;  %448 = vmatpush.bf16.msra.mxu0 %v907_v0  ;;  %v905_v2 = vld [vmem:[%s247_s25 + $0x28] sm:$0xff]  ;;  %v904_v3 = vld [vmem:[%s247_s25 + $0x20] sm:$0xff]  ;;  %v903_v4 = vld [vmem:[%s247_s25 + $0x18] sm:$0xff]  ;;  %s1397_s20 = scalar_lea.vmem [#allocation9], %s820_s18  ;;  %s675_s26 = scalar_lea.hbm %s1457_s3, %s908_s30 }
  0x34   : > { %v902_v5 = vld [vmem:[%s247_s25 + $0x10] sm:$0xff]  ;;  %v901_v6 = vld [vmem:[%s247_s25 + $0x8] sm:$0xff]  ;;  %v900_v7 = vld [vmem:[%s247_s25] sm:$0xff]  ;;  %s676_s27 = sshll.u32 %s1397_s20, 4  ;;  %s678_s7 = sshll.u32 %s675_s26, 4  ;;  %s677_s27 = int_to_ptr.vmem [resolvable:$true] %s676_s27  ;;  %s679_s7 = int_to_ptr.hbm [resolvable:$true] %s678_s7 }
  0x35   : > { %v896_v8 = vld [vmem:[%s1373_s8 + $0x20] sm:$0xff]  ;;  %v897_v10 = vld [vmem:[%s1373_s8 + $0x28] sm:$0xff]  ;;  %v947_v12 = vld [vmem:[#allocation8 + $0x38] sm:$0xff]   ;;  %s662_s4 = scalar_lea.sflag [#allocation5], %s1369_s28  ;;  %s1158_s19 = sshra.s32 %s679_s7, 4  ;;  %s1159_s19 = int_to_ptr.hbm [resolvable:$true] %s1158_s19 }
  0x36   : > { %v892_v9 = vld [vmem:[%s1373_s8] sm:$0xff]  ;;  %v893_v11 = vld [vmem:[%s1373_s8 + $0x8] sm:$0xff]  ;;  %v946_v13 = vld [vmem:[#allocation8 + $0x30] sm:$0xff]   ;;  %v940_v14 = vunpack.c.h.bf16 %v947_v12  ;;  %v939_v15 = vunpack.c.l.bf16 %v947_v12  ;;  %s1160_s22 = scalar_lea.hbm %s1159_s19, 128  ;;  %s1164_s23 = scalar_lea.hbm %s1457_s3, 256 }
  0x37   : > { %949 = vmatpush.bf16.msra.mxu2 %v906_v1  ;;  %449 = vmatpush.bf16.msra.mxu0 %v906_v1  ;;  %v936_v16 = vunpack.c.h.bf16 %v946_v13  ;;  %v945_v17 = vld [vmem:[#allocation8 + $0x28] sm:$0xff]   ;;  %v935_v18 = vunpack.c.l.bf16 %v946_v13  ;;  %v944_v20 = vld [vmem:[#allocation8 + $0x20] sm:$0xff]   ;;  %v898_v23 = vld [vmem:[%s1373_s8 + $0x30] sm:$0xff]  ;;  %p1161_p1 = scmp.ne.s32.totalorder %s1159_s19, %s1160_s22  ;;  %p1165_p10 = scmp.lt.s32.totalorder %s1159_s19, %s1457_s3 }
  0x38   : > { %580 = vmatpush.msra.mxu1 %v940_v14  ;;  %956 = vmatpush.msra.mxu3 %v940_v14  ;;  %v932_v19 = vunpack.c.h.bf16 %v945_v17  ;;  %v931_v21 = vunpack.c.l.bf16 %v945_v17  ;;  %v928_v22 = vunpack.c.h.bf16 %v944_v20  ;;  %v894_v24 = vld [vmem:[%s1373_s8 + $0x10] sm:$0xff]  ;;  %v943_v25 = vld [vmem:[#allocation8 + $0x18] sm:$0xff]   ;;  %v927_v26 = vunpack.c.l.bf16 %v944_v20  ;;  %v941_v31 = vld [vmem:[#allocation8 + $0x8] sm:$0xff]   ;;  %p1166_p12 = scmp.lt.s32.totalorder %s1164_s23, %s1160_s22 }
  0x39   : > { %v924_v27 = vunpack.c.h.bf16 %v943_v25  ;;  %v942_v28 = vld [vmem:[#allocation8 + $0x10] sm:$0xff]   ;;  %v923_v29 = vunpack.c.l.bf16 %v943_v25  ;;  %v916_v33 = vunpack.c.h.bf16 %v941_v31  ;;  %v910_v34 = vld [vmem:[#allocation8] sm:$0xff]   ;;  %v915_v35 = vunpack.c.l.bf16 %v941_v31  ;;  %v899_v37 = vld [vmem:[%s1373_s8 + $0x38] sm:$0xff]  ;;  %p1162_p4 = pnand %p1161_p1, %p1339_p5 }
  0x3a   : > { %581 = vmatpush.msra.mxu1 %v939_v15  ;;  %957 = vmatpush.msra.mxu3 %v939_v15  ;;  %v920_v30 = vunpack.c.h.bf16 %v942_v28  ;;  %v919_v32 = vunpack.c.l.bf16 %v942_v28  ;;  %v912_v36 = vunpack.c.h.bf16 %v910_v34  ;;  %v895_v38 = vld [vmem:[%s1373_s8 + $0x18] sm:$0xff]  ;;  %v911_v39 = vunpack.c.l.bf16 %v910_v34  ;;  %p1167_p13 = por %p1166_p12, %p1165_p10 }
  0x3b   : > { %950 = vmatpush.bf16.msra.mxu2 %v905_v2  ;;  %450 = vmatpush.bf16.msra.mxu0 %v905_v2  ;;  %p1163_p8 = pneg %p1162_p4 }
  0x3c   : > { %582 = vmatpush.msra.mxu1 %v936_v16  ;;  %958 = vmatpush.msra.mxu3 %v936_v16 }
  0x3d   : > { %p1168_p0 = pnand %p1167_p13, %p1163_p8 }
  0x3e   : > { %583 = vmatpush.msra.mxu1 %v935_v18  ;;  %959 = vmatpush.msra.mxu3 %v935_v18 }
  0x3f   : > { %951 = vmatpush.bf16.msra.mxu2 %v904_v3  ;;  %451 = vmatpush.bf16.msra.mxu0 %v904_v3 }
  0x40   : > { %584 = vmatpush.msra.mxu1 %v932_v19  ;;  %960 = vmatpush.msra.mxu3 %v932_v19 }
  0x42   : > { %585 = vmatpush.msra.mxu1 %v931_v21  ;;  %961 = vmatpush.msra.mxu3 %v931_v21 }
  0x43   : > { %952 = vmatpush.bf16.msra.mxu2 %v903_v4  ;;  %452 = vmatpush.bf16.msra.mxu0 %v903_v4 }
  0x44   : > { %586 = vmatpush.msra.mxu1 %v928_v22  ;;  %962 = vmatpush.msra.mxu3 %v928_v22 }
  0x46   : > { %587 = vmatpush.msra.mxu1 %v927_v26  ;;  %963 = vmatpush.msra.mxu3 %v927_v26 }
  0x47   : > { %953 = vmatpush.bf16.msra.mxu2 %v902_v5  ;;  %453 = vmatpush.bf16.msra.mxu0 %v902_v5 }
  0x48   : > { %588 = vmatpush.msra.mxu1 %v924_v27  ;;  %964 = vmatpush.msra.mxu3 %v924_v27 }
  0x4a   : > { %589 = vmatpush.msra.mxu1 %v923_v29  ;;  %965 = vmatpush.msra.mxu3 %v923_v29 }
  0x4b   : > { %954 = vmatpush.bf16.msra.mxu2 %v901_v6  ;;  %454 = vmatpush.bf16.msra.mxu0 %v901_v6 }
  0x4c   : > { %590 = vmatpush.msra.mxu1 %v920_v30  ;;  %966 = vmatpush.msra.mxu3 %v920_v30 }
  0x4e   : > { %591 = vmatpush.msra.mxu1 %v919_v32  ;;  %967 = vmatpush.msra.mxu3 %v919_v32 }
  0x4f   : > { %955 = vmatpush.bf16.msra.mxu2 %v900_v7  ;;  %455 = vmatpush.bf16.msra.mxu0 %v900_v7 }
  0x50   : > { %592 = vmatpush.msra.mxu1 %v916_v33  ;;  %968 = vmatpush.msra.mxu3 %v916_v33 }
  0x52   : > { %476 = vmatmul.bf16.vlgmr.msra.gmra.mxu2 %v896_v8  ;;  %456 = vmatmul.bf16.vlgmr.msra.gmra.mxu0 %v892_v9 }
  0x53   : > { %593 = vmatpush.msra.mxu1 %v915_v35  ;;  %969 = vmatpush.msra.mxu3 %v915_v35 }
  0x55   : > { %594 = vmatpush.msra.mxu1 %v912_v36  ;;  %970 = vmatpush.msra.mxu3 %v912_v36 }
  0x57   : > { %595 = vmatpush.msra.mxu1 %v911_v39  ;;  %971 = vmatpush.msra.mxu3 %v911_v39 }
  0x62   : > { %481 = vmatmul.bf16.gmra.mxu2 %v897_v10  ;;  %461 = vmatmul.bf16.gmra.mxu0 %v893_v11 }
  0x72   : > { %486 = vmatmul.bf16.gmra.mxu2 %v898_v23  ;;  %466 = vmatmul.bf16.gmra.mxu0 %v894_v24 }
  0x82   : > { %491 = vmatmul.bf16.gmra.mxu2 %v899_v37  ;;  %471 = vmatmul.bf16.gmra.mxu0 %v895_v38 }
  0xcf   : > { %v457_v40 = vpop.f32.mrf.mxu0 }
  0xd0   : > { %596 = vmatmul.f32.vlgmr.msra.gmra.mxu1 %v457_v40 }
  0xd5   : > { %v477_v41 = vpop.f32.mrf.mxu2 }
  0xd6   : > { %620 = vmatmul.f32.vlgmr.msra.gmra.mxu3 %v477_v41 }
  0xd7   : > { %v459_v42 = vpop.f32.mrf.mxu0 }
  0xd8   : > { %599 = vmatmul.f32.gmra.mxu1 %v459_v42 }
  0xdd   : > { %v479_v43 = vpop.f32.mrf.mxu2 }
  0xde   : > { %623 = vmatmul.f32.gmra.mxu3 %v479_v43 }
  0xdf   : > { %v462_v44 = vpop.f32.mrf.mxu0 }
  0xe0   : > { %602 = vmatmul.f32.gmra.mxu1 %v462_v44 }
  0xe5   : > { %v482_v45 = vpop.f32.mrf.mxu2 }
  0xe6   : > { %626 = vmatmul.f32.gmra.mxu3 %v482_v45 }
  0xe7   : > { %v464_v46 = vpop.f32.mrf.mxu0 }
  0xe8   : > { %605 = vmatmul.f32.gmra.mxu1 %v464_v46 }
  0xed   : > { %v484_v47 = vpop.f32.mrf.mxu2 }
  0xee   : > { %629 = vmatmul.f32.gmra.mxu3 %v484_v47 }
  0xef   : > { %v467_v48 = vpop.f32.mrf.mxu0 }
  0xf0   : > { %608 = vmatmul.f32.gmra.mxu1 %v467_v48 }
  0xf5   : > { %v487_v49 = vpop.f32.mrf.mxu2 }
  0xf6   : > { %632 = vmatmul.f32.gmra.mxu3 %v487_v49 }
  0xf7   : > { %v469_v50 = vpop.f32.mrf.mxu0 }
  0xf8   : > { %611 = vmatmul.f32.gmra.mxu1 %v469_v50 }
  0xfd   : > { %v489_v51 = vpop.f32.mrf.mxu2 }
  0xfe   : > { %635 = vmatmul.f32.gmra.mxu3 %v489_v51 }
  0xff   : > { %v472_v52 = vpop.f32.mrf.mxu0 }
 0x100   : > { %614 = vmatmul.f32.gmra.mxu1 %v472_v52 }
 0x105   : > { %v492_v53 = vpop.f32.mrf.mxu2 }
 0x106   : > { %638 = vmatmul.f32.gmra.mxu3 %v492_v53 }
 0x107   : > { %v474_v54 = vpop.f32.mrf.mxu0 }
 0x108   : > { %617 = vmatmul.f32.gmra.mxu1 %v474_v54 }
 0x10d   : > { %v494_v55 = vpop.f32.mrf.mxu2 }
 0x10e   : > { %641 = vmatmul.f32.gmra.mxu3 %v494_v55 }
 0x14d   : > { %v597_v56 = vpop.f32.mrf.mxu1 }
 0x14e   : > { %645 = vst [vmem:[%s1397_s20] sm:$0xff] %v597_v56 }
 0x155   : > { %v600_v57 = vpop.f32.mrf.mxu1 }
 0x156   : > { %646 = vst [vmem:[%s1397_s20 + $0x8] sm:$0xff] %v600_v57 }
 0x159   : > { %v621_v58 = vpop.f32.mrf.mxu3 }
 0x15a   : > { %653 = vst [vmem:[%s1397_s20 + $0x40] sm:$0xff] %v621_v58 }
 0x15d   : > { %v603_v59 = vpop.f32.mrf.mxu1 }
 0x15e   : > { %647 = vst [vmem:[%s1397_s20 + $0x10] sm:$0xff] %v603_v59 }
 0x161   : > { %v624_v60 = vpop.f32.mrf.mxu3 }
 0x162   : > { %654 = vst [vmem:[%s1397_s20 + $0x48] sm:$0xff] %v624_v60 }
 0x165   : > { %v606_v61 = vpop.f32.mrf.mxu1 }
 0x166   : > { %648 = vst [vmem:[%s1397_s20 + $0x18] sm:$0xff] %v606_v61 }
 0x169   : > { %v627_v62 = vpop.f32.mrf.mxu3 }
 0x16a   : > { %655 = vst [vmem:[%s1397_s20 + $0x50] sm:$0xff] %v627_v62 }
 0x16d   : > { %v609_v63 = vpop.f32.mrf.mxu1 }
 0x16e   : > { %649 = vst [vmem:[%s1397_s20 + $0x20] sm:$0xff] %v609_v63 }
 0x171   : > { %v630_v0 = vpop.f32.mrf.mxu3 }
 0x172   : > { %656 = vst [vmem:[%s1397_s20 + $0x58] sm:$0xff] %v630_v0 }
 0x175   : > { %v612_v1 = vpop.f32.mrf.mxu1 }
 0x176   : > { %650 = vst [vmem:[%s1397_s20 + $0x28] sm:$0xff] %v612_v1 }
 0x179   : > { %v633_v2 = vpop.f32.mrf.mxu3 }
 0x17a   : > { %657 = vst [vmem:[%s1397_s20 + $0x60] sm:$0xff] %v633_v2 }
 0x17d   : > { %v615_v3 = vpop.f32.mrf.mxu1 }
 0x17e   : > { %651 = vst [vmem:[%s1397_s20 + $0x30] sm:$0xff] %v615_v3 }
 0x181   : > { %v636_v4 = vpop.f32.mrf.mxu3 }
 0x182   : > { %658 = vst [vmem:[%s1397_s20 + $0x68] sm:$0xff] %v636_v4 }
 0x185   : > { %v618_v5 = vpop.f32.mrf.mxu1 }
 0x186   : > { %652 = vst [vmem:[%s1397_s20 + $0x38] sm:$0xff] %v618_v5 }
 0x189   : > { %v639_v6 = vpop.f32.mrf.mxu3 }
 0x18a   : > { %659 = vst [vmem:[%s1397_s20 + $0x70] sm:$0xff] %v639_v6 }
 0x191   : > { %v642_v7 = vpop.f32.mrf.mxu3 }
 0x192   : > { %660 = vst [vmem:[%s1397_s20 + $0x78] sm:$0xff] %v642_v7 }
 0x193   : > { %1171 = shalt.err (!%p1168_p0)
}
 0x194   : > { %s1239_s28 = smov 128   ;;  %s1240_s8 = smov 8  }
 0x195   : > { %980 = dma.vmem_to_hbm [thread:$0]  (%p1339_p5), %s677_s27, 2048, %s679_s7, %s662_s4, %s1239_s28, %s1239_s28, %s1240_s8  }
 0x196 PF: > { %s693_s2 = sand.u32 1, %s1214_s12   ;;  %p994_p3 = pnand %p809_p11, %p1306_p6 }
 0x197   : > { %s694_s16 = scalar_lea.sflag [#allocation5], %s693_s2 }
 0x198   : > { %p995_p7 = pneg %p994_p3 }
 0x19a   : > { %1209 = dma.done.wait (%p995_p7), %s694_s16, 2048  }
 0x19b   : > { %1211 = vsyncadd (%p995_p7), %s694_s16, 4294965248  ;;  %s22_s17 = sadd.s32 1, %s1234_s17   ;;  %s1475_s15 = sld [smem:[#allocation14_spill]] }
 0x19c   : > { %p19_p9 = scmp.ge.s32.totalorder %s22_s17, 4   ;;  %s1476_s16 = sld [smem:[#allocation15_spill]] }
 0x19d   : > { %s1477_s12 = smov %s1218_s13  ;;  %s1478_s13 = smov %s1222_s14 }
 0x19e   : > { %s1479_s14 = smov %s1348_s10  ;;  %21 = sbr.rel (!%p19_p9) target bundleno = 10 (0xa), region = 102 }
 0x1a3   :  { %700 = vsyncpa [#allocation4], 1 }
 0x1a4   :  { %702 = vsyncpa [#allocation4 + $0x1], 1 }
 0x1a5   :  { %703 = vsyncpa [#allocation7], 1 }
 0x1a6   :  { %705 = vsyncpa [#allocation7 + $0x1], 1 }
 0x1a7   :  { %706 = vsyncpa [#allocation5], 1 }
 0x1a8   :  { %708 = vsyncpa [#allocation5 + $0x1], 1 }

</bundles_post_ra>
